<compile_context>
chip_gen: v6e
topology: v6e:2x2x1
jax: 0.10.0
libtpu: 0.0.40
codegen_flags: <defaults>
</compile_context>

<pallas_src>
import math
import functools

import jax
import jax.numpy as jnp
from jax.experimental import pallas as pl
from jax.experimental.pallas import tpu as pltpu


def _round_up(x, m):
    return (x + m - 1) // m * m


# ----------------------------- Pallas kernel --------------------------------
def critic_kernel(x_ref, w_ref, b_ref, bv_ref, o_ref, *, F, d1, d2, d3, r1, r2):
    """One batch tile of the Critic MLP.

    x_ref : (tb, F)    float32 activations (cast to the compute dtype in-kernel)
    w_ref : (R, Wl)    packed weight slab (compute dtype), single DMA, constant
                       block index across the batch grid so it stays resident:
                         rows [0, F)        : W1 (F,  d1)
                         rows [r1, r1+d1)   : W2 (d1, d2)   in lanes [0, d2)
                         rows [r2, r2+d2)   : W3 (d2, d3)   in lanes [0, d3)
    b_ref : (8, Wl)    float32 bias / value-head slab:
                         row 0: b1, row 1: b2, row 2: b3, row 3: wv
    bv_ref: (1,)       float32 value-head bias (SMEM scalar)
    o_ref : (1, 1, tb) float32 values, lane-dense row per tile
    """
    cdt = w_ref.dtype
    x = x_ref[...].astype(cdt)          # in-kernel cast, hidden under DMA/MXU

    # layer 1: (tb,F) @ (F,d1) + b1 -> ReLU        (fp32 accumulation)
    h = jnp.dot(x, w_ref[0:F, 0:d1], preferred_element_type=jnp.float32)
    h = jnp.maximum(h + b_ref[0:1, 0:d1], 0.0)

    # layer 2: (tb,d1) @ (d1,d2) + b2 -> ReLU
    h = jnp.dot(h.astype(cdt), w_ref[r1:r1 + d1, 0:d2],
                preferred_element_type=jnp.float32)
    h = jnp.maximum(h + b_ref[1:2, 0:d2], 0.0)

    # layer 3: (tb,d2) @ (d2,d3) + b3 -> ReLU
    h = jnp.dot(h.astype(cdt), w_ref[r2:r2 + d2, 0:d3],
                preferred_element_type=jnp.float32)
    h = jnp.maximum(h + b_ref[2:3, 0:d3], 0.0)

    # value head: contract the d3 axis of wv (1,d3) against h (tb,d3) so the
    # result lands as a lane-dense (1, tb) row (unmasked vector stores) instead
    # of a (tb, 1) column of masked partial stores.
    wv = b_ref[3:4, 0:d3]                                   # (1, d3) float32
    v = jax.lax.dot_general(wv, h, (((1,), (1,)), ((), ())),
                            preferred_element_type=jnp.float32)  # (1, tb)
    o_ref[0] = v + bv_ref[0]                                # bv is an SMEM scalar


# --------------------------- parameter packing -------------------------------
def pack_critic_params(params, compute_dtype=jnp.bfloat16):
    """Pack the 4 sampled BayesLinear layers into one weight slab + one bias slab.

    Done once, outside the per-call hot path: cuts 8 small per-call parameter
    DMAs down to 2 (plus an SMEM scalar) and casts the MXU operands to the
    compute dtype (bf16 by default -> half the weight DMA bytes, 2x MXU
    packing).  Biases and the value-head weights stay float32.
    """
    (w1, b1), (w2, b2), (w3, b3), (wv, bv) = params
    F, d1 = w1.shape
    d2 = w2.shape[1]
    d3 = w3.shape[1]
    Wl = _round_up(max(d1, d2, d3), 128)        # slab lane width
    r1 = _round_up(F, 8)                        # W2 row offset (sublane aligned)
    r2 = _round_up(r1 + d1, 8)                  # W3 row offset
    R = _round_up(r2 + d2, 8)

    slab = jnp.zeros((R, Wl), dtype=compute_dtype)
    slab = slab.at[0:F, 0:d1].set(w1.astype(compute_dtype))
    slab = slab.at[r1:r1 + d1, 0:d2].set(w2.astype(compute_dtype))
    slab = slab.at[r2:r2 + d2, 0:d3].set(w3.astype(compute_dtype))

    bias = jnp.zeros((8, Wl), dtype=jnp.float32)
    bias = bias.at[0, 0:d1].set(b1.reshape(-1).astype(jnp.float32))
    bias = bias.at[1, 0:d2].set(b2.reshape(-1).astype(jnp.float32))
    bias = bias.at[2, 0:d3].set(b3.reshape(-1).astype(jnp.float32))
    bias = bias.at[3, 0:d3].set(wv.reshape(-1).astype(jnp.float32))
    bv_s = bv.reshape(1).astype(jnp.float32)

    dims = dict(F=F, d1=d1, d2=d2, d3=d3, r1=r1, r2=r2)
    return (slab, bias, bv_s), dims


# ------------------------------ host wrapper ---------------------------------
def critic_forward(x, packed, dims, *, max_block_b=1024, split_threshold=512):
    """x: (B, state_stack, input_dim) or (B, F) float32.  Returns (B, 1) float32."""
    slab, bias, bv_s = packed
    B = x.shape[0]
    x_flat = x.reshape(B, -1)               # == x.view(B, -1); metadata only
    F = dims["F"]
    assert x_flat.shape[1] == F

    kernel = functools.partial(
        critic_kernel, F=F, d1=dims["d1"], d2=dims["d2"], d3=dims["d3"],
        r1=dims["r1"], r2=dims["r2"])

    smem_spec = pl.BlockSpec(memory_space=pltpu.MemorySpace.SMEM)

    if B <= split_threshold:
        # Small batch: one full block, no grid -> no pipeline machinery, no pad.
        tb, n_blocks = B, 1
        grid = ()
        x_in = x_flat
        in_specs = [
            pl.BlockSpec((tb, F), lambda: (0, 0)),
            pl.BlockSpec(slab.shape, lambda: (0, 0)),
            pl.BlockSpec(bias.shape, lambda: (0, 0)),
            smem_spec,
        ]
        out_spec = pl.BlockSpec((1, 1, tb), lambda: (0, 0, 0))
        compiler_params = None
    else:
        # Large batch: big tiles (amortize per-step overhead), but always at
        # least 2 blocks so the "parallel" batch axis shards across both
        # TensorCores on v7x.  Weight/bias slabs keep a constant block index,
        # so they are DMA'd once and stay resident across grid steps.
        n_blocks = max(2, -(-B // max_block_b))
        tb = _round_up(-(-B // n_blocks), 128)
        n_blocks = -(-B // tb)
        B_pad = n_blocks * tb
        # Pad only when the last tile is ragged (zeros; rows dropped below).
        x_in = jnp.pad(x_flat, ((0, B_pad - B), (0, 0))) if B_pad != B else x_flat
        grid = (n_blocks,)
        in_specs = [
            pl.BlockSpec((tb, F), lambda i: (i, 0)),
            pl.BlockSpec(slab.shape, lambda i: (0, 0)),
            pl.BlockSpec(bias.shape, lambda i: (0, 0)),
            smem_spec,
        ]
        out_spec = pl.BlockSpec((1, 1, tb), lambda i: (i, 0, 0))
        compiler_params = pltpu.CompilerParams(
            dimension_semantics=("parallel",))

    out = pl.pallas_call(
        kernel,
        out_shape=jax.ShapeDtypeStruct((n_blocks, 1, tb), jnp.float32),
        grid=grid,
        in_specs=in_specs,
        out_specs=out_spec,
        compiler_params=compiler_params,
    )(x_in, slab, bias, bv_s)

    # (n_blocks, 1, tb) row-major is exactly batch order; padded rows dropped.
    return out.reshape(-1)[:B].reshape(B, 1)


# --------------------------- parameter construction -------------------------
def make_bayes_linear_params(key, in_features, out_features,
                             prior_mu=0.0, prior_sigma=0.1):
    """Deterministically build a sampled BayesLinear layer: W = mu + sigma*eps."""
    k_mu_w, k_eps_w, k_mu_b, k_eps_b = jax.random.split(key, 4)
    bound = 1.0 / math.sqrt(in_features)
    w_mu = jax.random.uniform(k_mu_w, (in_features, out_features),
                              jnp.float32, -bound, bound)
    b_mu = jax.random.uniform(k_mu_b, (1, out_features),
                              jnp.float32, -bound, bound)
    sigma = jnp.float32(prior_sigma)  # log_sigma initialized to log(prior_sigma)
    w_eps = jax.random.normal(k_eps_w, (in_features, out_features), jnp.float32)
    b_eps = jax.random.normal(k_eps_b, (1, out_features), jnp.float32)
    W = w_mu + sigma * w_eps
    b = b_mu + sigma * b_eps
    return W, b


def build_critic_params(key, state_stack, input_dim, architecture=(256, 128, 64)):
    dims = [state_stack * input_dim] + list(architecture)
    keys = jax.random.split(key, len(dims))  # 3 base layers + value head
    params = []
    for i in range(len(architecture)):
        params.append(make_bayes_linear_params(keys[i], dims[i], dims[i + 1]))
    params.append(make_bayes_linear_params(keys[-1], architecture[-1], 1))
    return params


# TODO(synk): BNNBase source was not provided; assumed to be a BayesLinear+ReLU
# MLP over `architecture` (standard for this PPO codebase).  BayesLinear weight
# sampling itself is parameter glue done in plain JAX outside the kernel.

# ---------------------------------- main -------------------------------------
if __name__ == "__main__":
    key = jax.random.PRNGKey(0)
    k_params, k_x1, k_x2 = jax.random.split(key, 3)

    state_stack = 4
    input_dim = 11
    architecture = (256, 128, 64)

    params = build_critic_params(k_params, state_stack, input_dim, architecture)

    def reference(x_flat, compute_dtype):
        # Mirrors the kernel's numerics: MXU operands quantized to the compute
        # dtype, fp32 accumulation, fp32 biases and value head.
        hp = jax.lax.Precision.HIGHEST
        q = lambda a: a.astype(compute_dtype).astype(jnp.float32)
        h = x_flat
        for (Wl, bl) in params[:-1]:
            h = jnp.maximum(jnp.dot(q(h), q(Wl), precision=hp) + bl, 0.0)
        Wv, bv = params[-1]
        return jnp.dot(h, Wv, precision=hp) + bv

    # 1) small batch, f32 compute: single full block, no grid machinery.
    packed_f32, dims = pack_critic_params(params, compute_dtype=jnp.float32)
    batch_small = 8
    x_small = jax.random.normal(
        k_x1, (batch_small, state_stack, input_dim), jnp.float32)
    v_small = jax.block_until_ready(critic_forward(x_small, packed_f32, dims))
    assert v_small.shape == (batch_small, 1)
    ref_small = reference(x_small.reshape(batch_small, -1), jnp.float32)
    assert jnp.allclose(v_small, ref_small, atol=1e-4, rtol=1e-4)

    # 2) larger ragged batch, bf16 MXU operands (default): two 1024-row tiles
    #    on a "parallel" grid axis (v7x megacore), f32 accumulation.
    packed_bf16, dims = pack_critic_params(params, compute_dtype=jnp.bfloat16)
    batch_big = 2000            # pads to 2048 -> grid of 2 tiles of 1024 rows
    x_big = jax.random.normal(
        k_x2, (batch_big, state_stack, input_dim), jnp.float32)
    v_big = jax.block_until_ready(critic_forward(x_big, packed_bf16, dims))
    assert v_big.shape == (batch_big, 1)
    ref_big = reference(x_big.reshape(batch_big, -1), jnp.bfloat16)
    assert jnp.allclose(v_big, ref_big, atol=2e-3, rtol=2e-3)

    print("KERNEL_OK")
</pallas_src>

<mosaic_0001>
module attributes {stable_mosaic.version = 11 : i64} {
  func.func @critic_kernel(%arg0: memref<8x44xf32, #tpu.memory_space<vmem>>, %arg1: memref<432x256xf32, #tpu.memory_space<vmem>>, %arg2: memref<8x256xf32, #tpu.memory_space<vmem>>, %arg3: memref<1xf32, #tpu.memory_space<smem>>, %arg4: memref<1x1x8xf32, #tpu.memory_space<vmem>>) attributes {dimension_semantics = [], scalar_prefetch = 0 : i64, scratch_operands = 0 : i64, tpu.core_type = #tpu.core_type<tc>} {
    %c0 = arith.constant 0 : index
    %c0_0 = arith.constant 0 : index
    %0 = vector.load %arg0[%c0, %c0_0] : memref<8x44xf32, #tpu.memory_space<vmem>>, vector<8x44xf32>
    %c0_1 = arith.constant 0 : index
    %c0_2 = arith.constant 0 : index
    %1 = vector.load %arg1[%c0_1, %c0_2] : memref<432x256xf32, #tpu.memory_space<vmem>>, vector<44x256xf32>
    %cst = arith.constant dense<0.000000e+00> : vector<8x256xf32>
    %2 = tpu.matmul %0, %1, %cst {dimension_numbers = #tpu.dot_dimension_numbers<[1], [0], [0], [1], [0, 0, 1, 1], [], []>} : vector<8x44xf32>, vector<44x256xf32>, vector<8x256xf32> -> vector<8x256xf32>
    %c0_3 = arith.constant 0 : index
    %c0_4 = arith.constant 0 : index
    %3 = vector.load %arg2[%c0_3, %c0_4] : memref<8x256xf32, #tpu.memory_space<vmem>>, vector<1x256xf32>
    %4 = vector.broadcast %3 : vector<1x256xf32> to vector<8x256xf32>
    %5 = arith.addf %2, %4 : vector<8x256xf32>
    %cst_5 = arith.constant 0.000000e+00 : f32
    %6 = vector.broadcast %cst_5 : f32 to vector<8x256xf32>
    %7 = arith.maximumf %5, %6 : vector<8x256xf32>
    %c48 = arith.constant 48 : index
    %c0_6 = arith.constant 0 : index
    %8 = vector.load %arg1[%c48, %c0_6] : memref<432x256xf32, #tpu.memory_space<vmem>>, vector<256x128xf32>
    %cst_7 = arith.constant dense<0.000000e+00> : vector<8x128xf32>
    %9 = tpu.matmul %7, %8, %cst_7 {dimension_numbers = #tpu.dot_dimension_numbers<[1], [0], [0], [1], [0, 0, 1, 1], [], []>} : vector<8x256xf32>, vector<256x128xf32>, vector<8x128xf32> -> vector<8x128xf32>
    %c1 = arith.constant 1 : index
    %c0_8 = arith.constant 0 : index
    %10 = vector.load %arg2[%c1, %c0_8] : memref<8x256xf32, #tpu.memory_space<vmem>>, vector<1x128xf32>
    %11 = vector.broadcast %10 : vector<1x128xf32> to vector<8x128xf32>
    %12 = arith.addf %9, %11 : vector<8x128xf32>
    %cst_9 = arith.constant 0.000000e+00 : f32
    %13 = vector.broadcast %cst_9 : f32 to vector<8x128xf32>
    %14 = arith.maximumf %12, %13 : vector<8x128xf32>
    %c304 = arith.constant 304 : index
    %c0_10 = arith.constant 0 : index
    %15 = vector.load %arg1[%c304, %c0_10] : memref<432x256xf32, #tpu.memory_space<vmem>>, vector<128x64xf32>
    %cst_11 = arith.constant dense<0.000000e+00> : vector<8x64xf32>
    %16 = tpu.matmul %14, %15, %cst_11 {dimension_numbers = #tpu.dot_dimension_numbers<[1], [0], [0], [1], [0, 0, 1, 1], [], []>} : vector<8x128xf32>, vector<128x64xf32>, vector<8x64xf32> -> vector<8x64xf32>
    %c2 = arith.constant 2 : index
    %c0_12 = arith.constant 0 : index
    %17 = vector.load %arg2[%c2, %c0_12] : memref<8x256xf32, #tpu.memory_space<vmem>>, vector<1x64xf32>
    %18 = vector.broadcast %17 : vector<1x64xf32> to vector<8x64xf32>
    %19 = arith.addf %16, %18 : vector<8x64xf32>
    %cst_13 = arith.constant 0.000000e+00 : f32
    %20 = vector.broadcast %cst_13 : f32 to vector<8x64xf32>
    %21 = arith.maximumf %19, %20 : vector<8x64xf32>
    %c3 = arith.constant 3 : index
    %c0_14 = arith.constant 0 : index
    %22 = vector.load %arg2[%c3, %c0_14] : memref<8x256xf32, #tpu.memory_space<vmem>>, vector<1x64xf32>
    %cst_15 = arith.constant dense<0.000000e+00> : vector<1x8xf32>
    %23 = tpu.matmul %22, %21, %cst_15 {dimension_numbers = #tpu.dot_dimension_numbers<[1], [1], [0], [0], [0, 0, 1, 0], [], []>} : vector<1x64xf32>, vector<8x64xf32>, vector<1x8xf32> -> vector<1x8xf32>
    %c0_16 = arith.constant 0 : index
    %24 = memref.load %arg3[%c0_16] : memref<1xf32, #tpu.memory_space<smem>>
    %25 = vector.broadcast %24 : f32 to vector<1x8xf32>
    %26 = arith.addf %23, %25 : vector<1x8xf32>
    %c0_17 = arith.constant 0 : index
    %c0_18 = arith.constant 0 : index
    %c0_19 = arith.constant 0 : index
    %27 = vector.load %arg4[%c0_17, %c0_18, %c0_19] : memref<1x1x8xf32, #tpu.memory_space<vmem>>, vector<1x1x8xf32>
    %28 = vector.shape_cast %27 : vector<1x1x8xf32> to vector<1x8xf32>
    %29 = vector.shape_cast %26 : vector<1x8xf32> to vector<1x1x8xf32>
    tpu.vector_store %arg4[%c0_17, %c0_18, %c0_19], %29 {strides = array<i32>} : memref<1x1x8xf32, #tpu.memory_space<vmem>>, vector<1x1x8xf32>,
    return
  }
}

</mosaic_0001>

<bundles_post_ra>
// kernel: tpu_custom_call.1
= control target key start
LH: loop header
LB: loop body
LE: loop exit
PB: predicated region body
PF: predicated region fallthrough
CT: control target
= control target key end

     0   :  { %10 = vsyncpa [#allocation4], 0  ;;  %s716_s0 = inlined_call_operand.hbm [shape: f32[8,44], index: 0, kind: input, shape index: {}]   ;;  %s717_s1 = inlined_call_operand.hbm [shape: f32[432,256], index: 1, kind: input, shape index: {}]   ;;  %s718_s2 = inlined_call_operand.hbm [shape: f32[8,256], index: 2, kind: input, shape index: {}]   ;;  %s719_s3 = inlined_call_operand.<no memory space> [shape: f32[1], index: 3, kind: input, shape index: {}]   ;;  %s720_s4 = inlined_call_operand.hbm [shape: f32[1,1,8], index: 4, kind: output, shape index: {}]  }
   0x1   :  { %11 = vsyncpa [#allocation7], 0 }
   0x2   :  { %12 = vsyncpa [#allocation5], 0  ;;  %s648_s15 = smov [#allocation6]  }
   0x3   :  { %s28_s16 = sshll.u32 %s648_s15, 4  ;;  %s29_s16 = int_to_ptr.vmem [resolvable:$true] %s28_s16 }
   0x4   :  { %s570_s17 = scalar_lea.vmem %s29_s16, 13824  ;;  %p575_p1 = scmp.lt.s32.totalorder %s29_s16, %s29_s16 }
   0x5   :  { %p571_p0 = scmp.ne.s32.totalorder %s29_s16, %s570_s17  ;;  %p576_p2 = scmp.lt.s32.totalorder %s570_s17, %s570_s17 }
   0x7   :  { %p577_p3 = por %p576_p2, %p575_p1 }
   0x9   :  { %p578_p4 = pnand %p577_p3, %p571_p0 }
   0xb   :  { %581 = shalt.err (!%p578_p4)
}
   0xc   :  { %s649_s18 = smov 256   ;;  %s650_s19 = smov 16  }
   0xd   :  { %34 = dma.hbm_to_vmem [thread:$0]  %s717_s1, 13824, %s29_s16, [#allocation7], %s649_s18, %s649_s18, %s650_s19  }
   0xe   :  { %s651_s22 = smov [#allocation3]   ;;  %s652_s24 = smov [#allocation8]  }
   0xf   :  { %s19_s23 = sshll.u32 %s651_s22, 4  ;;  %s41_s25 = sshll.u32 %s652_s24, 4  ;;  %s20_s23 = int_to_ptr.vmem [resolvable:$true] %s19_s23  ;;  %s42_s25 = int_to_ptr.vmem [resolvable:$true] %s41_s25 }
  0x10   :  { %s590_s26 = scalar_lea.vmem %s20_s23, 128  ;;  %p595_p6 = scmp.lt.s32.totalorder %s20_s23, %s20_s23 }
  0x11   :  { %p591_p5 = scmp.ne.s32.totalorder %s20_s23, %s590_s26  ;;  %p596_p7 = scmp.lt.s32.totalorder %s590_s26, %s590_s26 }
  0x13   :  { %p597_p8 = por %p596_p7, %p595_p6 }
  0x15   :  { %p598_p9 = pnand %p597_p8, %p591_p5 }
  0x17   :  { %601 = shalt.err (!%p598_p9)
}
  0x18   :  { %22 = dma.hbm_to_vmem [thread:$0]  %s716_s0, 128, %s20_s23, [#allocation4]  }
  0x19   :  { %s610_s29 = scalar_lea.vmem %s42_s25, 256  ;;  %p615_p11 = scmp.lt.s32.totalorder %s42_s25, %s42_s25 }
  0x1a   :  { %p611_p10 = scmp.ne.s32.totalorder %s42_s25, %s610_s29  ;;  %p616_p12 = scmp.lt.s32.totalorder %s610_s29, %s610_s29 }
  0x1c   :  { %p617_p13 = por %p616_p12, %p615_p11 }
  0x1e   :  { %p618_p0 = pnand %p617_p13, %p611_p10 }
  0x20   :  { %621 = shalt.err (!%p618_p0)
}
  0x21   :  { %44 = dma.hbm_to_vmem [thread:$0]  %s718_s2, 256, %s42_s25, [#allocation7]  }
  0x22   :  { %642 = dma.done.wait [#allocation4], 128  }
  0x23   :  { %643 = vsyncadd [#allocation4], 4294967168 }
  0x24   :  { %644 = dma.done.wait [#allocation7], 14080  }
  0x25   :  { %645 = vsyncadd [#allocation7], 4294953216  ;;  %v653_v0 = vmov 0.0   ;;  %vm85_vm0 = vcmask 1043456   ;;  %v68_v1 = vld [vmem:[#allocation6 + $0x58] sm:$0xf]  ;;  %v71_v57 = vlaneseq }
  0x26   :  { %156 = vmatprep.mubr.f32.mxu0 %v653_v0  ;;  %v67_v2 = vld [vmem:[#allocation6 + $0x50] sm:$0xf]  ;;  %v66_v3 = vld [vmem:[#allocation6 + $0x48] sm:$0xff]  ;;  %455 = vmatprep.subr.msk.mxu0 %vm85_vm0, %v68_v1  ;;  %v65_v4 = vld [vmem:[#allocation6 + $0x40] sm:$0xff]  ;;  %vm81_vm1 = vcmask 359424   ;;  %vm654_vm2 = vmmov 0  }
  0x27   :  { %456 = vmatpush1.msk.msra.mxu0 %vm85_vm0, %v67_v2  ;;  %v64_v5 = vld [vmem:[#allocation6 + $0x38] sm:$0xff]  ;;  %v63_v6 = vld [vmem:[#allocation6 + $0x30] sm:$0xff]  ;;  %v62_v7 = vld [vmem:[#allocation6 + $0x28] sm:$0xff]  ;;  %v72_v58 = vshrl.u32 %v71_v57, 7  ;;  %vm360_vm3 = vcmask 523264   ;;  %s655_s5 = smov [#allocation9]  }
  0x28   :  { %114 = vmatprep.subr.mxu0 %v66_v3  ;;  %v196_v8 = vld [vmem:[#allocation6 + $0x250] sm:$0xff]  ;;  %v61_v10 = vld [vmem:[#allocation6 + $0x20] sm:$0xff]  ;;  %v60_v13 = vld [vmem:[#allocation6 + $0x18] sm:$0xff]  ;;  %s445_s6 = sshll.u32 %s655_s5, 4  ;;  %vm437_vm4 = vcmask 57344   ;;  %s446_s6 = int_to_ptr.vmem [resolvable:$true] %s445_s6 }
  0x29   :  { %115 = vmatpush1.msra.mxu0 %v65_v4  ;;  %v180_v9 = vld [vmem:[#allocation6 + $0x150] sm:$0xff]  ;;  %460 = vmatprep.subr.mxu1 %v196_v8  ;;  %v195_v11 = vld [vmem:[#allocation6 + $0x240] sm:$0xff]  ;;  %v58_v17 = vld [vmem:[#allocation6 + $0x8] sm:$0xff]  ;;  %v73_v59 = vsub.s32 0, %v72_v58  ;;  %v77_v61 = vsub.s32 1, %v72_v58  ;;  %s622_s7 = scalar_lea.vmem %s446_s6, 16  ;;  %p627_p2 = scmp.lt.s32.totalorder %s446_s6, %s446_s6 }
  0x2a   :  { %116 = vmatprep.subr.mxu0 %v64_v5  ;;  %v179_v12 = vld [vmem:[#allocation6 + $0x140] sm:$0xff]  ;;  %461 = vmatpush3.msra.mxu1 %v180_v9  ;;  %v194_v14 = vld [vmem:[#allocation6 + $0x230] sm:$0xff]  ;;  %v56_v21 = vld [vmem:[#allocation3] sm:$0xff]  ;;  %p623_p1 = scmp.ne.s32.totalorder %s446_s6, %s622_s7  ;;  %s626_s8 = scalar_lea.vmem %s446_s6, 32 }
  0x2b   :  { %117 = vmatpush1.msra.mxu0 %v63_v6  ;;  %v59_v15 = vld [vmem:[#allocation6 + $0x10] sm:$0xff]  ;;  %462 = vmatprep.subr.mxu1 %v195_v11  ;;  %v193_v18 = vld [vmem:[#allocation6 + $0x220] sm:$0xff]  ;;  %p628_p3 = scmp.lt.s32.totalorder %s626_s8, %s622_s7 }
  0x2c   :  { %118 = vmatprep.subr.mxu0 %v62_v7  ;;  %v178_v16 = vld [vmem:[#allocation6 + $0x130] sm:$0xff]  ;;  %463 = vmatpush3.msra.mxu1 %v179_v12  ;;  %v57_v19 = vld [vmem:[#allocation6] sm:$0xff] }
  0x2d   :  { %119 = vmatpush1.msra.mxu0 %v61_v10  ;;  %464 = vmatprep.subr.mxu1 %v194_v14  ;;  %v177_v20 = vld [vmem:[#allocation6 + $0x120] sm:$0xff]  ;;  %v192_v22 = vld [vmem:[#allocation6 + $0x210] sm:$0xff]  ;;  %p629_p4 = por %p628_p3, %p627_p2 }
  0x2e   :  { %120 = vmatprep.subr.mxu0 %v60_v13  ;;  %465 = vmatpush3.msra.mxu1 %v178_v16  ;;  %v176_v23 = vld [vmem:[#allocation6 + $0x110] sm:$0xff]  ;;  %v191_v24 = vld [vmem:[#allocation6 + $0x200] sm:$0xff] }
  0x2f   :  { %121 = vmatpush1.msra.mxu0 %v59_v15  ;;  %466 = vmatprep.subr.mxu1 %v193_v18  ;;  %v175_v25 = vld [vmem:[#allocation6 + $0x100] sm:$0xff]  ;;  %v190_v26 = vld [vmem:[#allocation6 + $0x1f0] sm:$0xff]  ;;  %p630_p5 = pnand %p629_p4, %p623_p1 }
  0x30   :  { %122 = vmatprep.subr.mxu0 %v58_v17  ;;  %467 = vmatpush3.msra.mxu1 %v177_v20  ;;  %v174_v27 = vld [vmem:[#allocation6 + $0xf0] sm:$0xff]  ;;  %v189_v28 = vld [vmem:[#allocation6 + $0x1e0] sm:$0xff] }
  0x31   :  { %123 = vmatpush1.msra.mxu0 %v57_v19  ;;  %468 = vmatprep.subr.mxu1 %v192_v22  ;;  %v173_v29 = vld [vmem:[#allocation6 + $0xe0] sm:$0xff]  ;;  %v188_v30 = vld [vmem:[#allocation6 + $0x1d0] sm:$0xff] }
  0x32   :  { %457 = vmatmul.mubr.msk.f32.vlgmr.msra.gmra.mxu0 %vm81_vm1, %v56_v21  ;;  %469 = vmatpush3.msra.mxu1 %v176_v23  ;;  %v172_v31 = vld [vmem:[#allocation6 + $0xd0] sm:$0xff]  ;;  %v187_v32 = vld [vmem:[#allocation6 + $0x1c0] sm:$0xff] }
  0x33   :  { %514 = vmatprep.subr.mxu0 %v653_v0  ;;  %470 = vmatprep.subr.mxu1 %v191_v24  ;;  %v171_v33 = vld [vmem:[#allocation6 + $0xc0] sm:$0xff]  ;;  %v186_v34 = vld [vmem:[#allocation6 + $0x1b0] sm:$0xff] }
  0x34   :  { %471 = vmatpush3.msra.mxu1 %v175_v25  ;;  %v170_v35 = vld [vmem:[#allocation6 + $0xb0] sm:$0xff]  ;;  %v185_v36 = vld [vmem:[#allocation6 + $0x1a0] sm:$0xff]  ;;  %546 = vmatprep.mubr.msk.f32.mxu0 %vm654_vm2, %v653_v0 }
  0x35   :  { %472 = vmatprep.subr.mxu1 %v190_v26  ;;  %v169_v37 = vld [vmem:[#allocation6 + $0xa0] sm:$0xff]  ;;  %v184_v38 = vld [vmem:[#allocation6 + $0x190] sm:$0xff] }
  0x36   :  { %473 = vmatpush3.msra.mxu1 %v174_v27  ;;  %v168_v39 = vld [vmem:[#allocation6 + $0x90] sm:$0xff]  ;;  %v183_v40 = vld [vmem:[#allocation6 + $0x180] sm:$0xff] }
  0x37   :  { %474 = vmatprep.subr.mxu1 %v189_v28  ;;  %v167_v41 = vld [vmem:[#allocation6 + $0x80] sm:$0xff]  ;;  %v182_v42 = vld [vmem:[#allocation6 + $0x170] sm:$0xff] }
  0x38   :  { %475 = vmatpush3.msra.mxu1 %v173_v29  ;;  %v166_v43 = vld [vmem:[#allocation6 + $0x70] sm:$0xff]  ;;  %v181_v44 = vld [vmem:[#allocation6 + $0x160] sm:$0xff] }
  0x39   :  { %476 = vmatprep.subr.mxu1 %v188_v30  ;;  %v165_v45 = vld [vmem:[#allocation6 + $0x60] sm:$0xff]  ;;  %v284_v46 = vld [vmem:[#allocation6 + $0x350] sm:$0xff] }
  0x3a   :  { %477 = vmatpush3.msra.mxu1 %v172_v31  ;;  %v283_v47 = vld [vmem:[#allocation6 + $0x340] sm:$0xff]  ;;  %515 = vmatpush3.msra.mxu0 %v284_v46  ;;  %v282_v48 = vld [vmem:[#allocation6 + $0x330] sm:$0xff] }
  0x3b   :  { %478 = vmatprep.subr.mxu1 %v187_v32  ;;  %516 = vmatprep.subr.mxu0 %v653_v0  ;;  %v281_v49 = vld [vmem:[#allocation6 + $0x320] sm:$0xff]  ;;  %v280_v50 = vld [vmem:[#allocation6 + $0x310] sm:$0xff] }
  0x3c   :  { %479 = vmatpush3.msra.mxu1 %v171_v33  ;;  %517 = vmatpush3.msra.mxu0 %v283_v47  ;;  %v279_v51 = vld [vmem:[#allocation6 + $0x300] sm:$0xff]  ;;  %v278_v52 = vld [vmem:[#allocation6 + $0x2f0] sm:$0xff] }
  0x3d   :  { %480 = vmatprep.subr.mxu1 %v186_v34  ;;  %518 = vmatprep.subr.mxu0 %v653_v0  ;;  %v277_v53 = vld [vmem:[#allocation6 + $0x2e0] sm:$0xff]  ;;  %v276_v54 = vld [vmem:[#allocation6 + $0x2d0] sm:$0xff] }
  0x3e   :  { %481 = vmatpush3.msra.mxu1 %v170_v35  ;;  %519 = vmatpush3.msra.mxu0 %v282_v48  ;;  %v275_v55 = vld [vmem:[#allocation6 + $0x2c0] sm:$0xff]  ;;  %v274_v56 = vld [vmem:[#allocation6 + $0x2b0] sm:$0xff] }
  0x3f   :  { %482 = vmatprep.subr.mxu1 %v185_v36  ;;  %520 = vmatprep.subr.mxu0 %v653_v0  ;;  %v69_v60 = vld [vmem:[#allocation8] ss:$8 sm:$0x3]  ;;  %v272_v8 = vld [vmem:[#allocation6 + $0x290] sm:$0xff]  ;;  %v197_v13 = vld [vmem:[#allocation8 + $0x1] ss:$0 sm:$0xff] }
  0x40   :  { %483 = vmatpush3.msra.mxu1 %v169_v37  ;;  %521 = vmatpush3.msra.mxu0 %v281_v49  ;;  %v74_v62 = vrot.slane %v69_v60, %v73_v59  ;;  %v78_v63 = vrot.slane %v69_v60, %v77_v61  ;;  %v273_v7 = vld [vmem:[#allocation6 + $0x2a0] sm:$0xff]  ;;  %v270_v10 = vld [vmem:[#allocation6 + $0x270] sm:$0xff] }
  0x41   :  { %484 = vmatprep.subr.mxu1 %v184_v38  ;;  %522 = vmatprep.subr.mxu0 %v653_v0  ;;  %v271_v9 = vld [vmem:[#allocation6 + $0x280] sm:$0xff] }
  0x42   :  { %485 = vmatpush3.msra.mxu1 %v168_v39  ;;  %523 = vmatpush3.msra.mxu0 %v280_v50  ;;  %v269_v11 = vld [vmem:[#allocation6 + $0x260] sm:$0xff] }
  0x43   :  { %486 = vmatprep.subr.mxu1 %v183_v40  ;;  %524 = vmatprep.subr.mxu0 %v653_v0  ;;  %v285_v18 = vld [vmem:[#allocation8 + $0x2] ss:$0 sm:$0xff]  ;;  %v357_v23 = vld [vmem:[#allocation8 + $0x3] ss:$0 sm:$0xff] }
  0x44   :  { %487 = vmatpush3.msra.mxu1 %v167_v41  ;;  %525 = vmatpush3.msra.mxu0 %v279_v51 }
  0x45   :  { %488 = vmatprep.subr.mxu1 %v182_v42  ;;  %526 = vmatprep.subr.mxu0 %v653_v0 }
  0x46   :  { %489 = vmatpush3.msra.mxu1 %v166_v43  ;;  %527 = vmatpush3.msra.mxu0 %v278_v52 }
  0x47   :  { %490 = vmatprep.subr.mxu1 %v181_v44  ;;  %528 = vmatprep.subr.mxu0 %v653_v0 }
  0x48   :  { %491 = vmatpush3.msra.mxu1 %v165_v45  ;;  %529 = vmatpush3.msra.mxu0 %v277_v53 }
  0x49   :  { %549 = vmatprep.subr.mxu1 %v653_v0  ;;  %530 = vmatprep.subr.mxu0 %v653_v0 }
  0x4a   :  { %531 = vmatpush3.msra.mxu0 %v276_v54 }
  0x4b   :  { %532 = vmatprep.subr.mxu0 %v653_v0 }
  0x4c   :  { %533 = vmatpush3.msra.mxu0 %v275_v55 }
  0x4d   :  { %534 = vmatprep.subr.mxu0 %v653_v0 }
  0x4e   :  { %535 = vmatpush3.msra.mxu0 %v274_v56 }
  0x4f   :  { %536 = vmatprep.subr.mxu0 %v653_v0 }
  0x50   :  { %537 = vmatpush3.msra.mxu0 %v273_v7 }
  0x51   :  { %538 = vmatprep.subr.mxu0 %v653_v0 }
  0x52   :  { %539 = vmatpush3.msra.mxu0 %v272_v8 }
  0x53   :  { %540 = vmatprep.subr.mxu0 %v653_v0 }
  0x54   :  { %541 = vmatpush3.msra.mxu0 %v271_v9 }
  0x55   :  { %542 = vmatprep.subr.mxu0 %v653_v0 }
  0x56   :  { %543 = vmatpush3.msra.mxu0 %v270_v10 }
  0x57   :  { %544 = vmatprep.subr.mxu0 %v653_v0 }
  0x58   :  { %545 = vmatpush3.msra.mxu0 %v269_v11 }
  0xf2   :  { %v158_v1 = vpop.f32.mrf.mxu0 }
  0xf3   :  { %v159_v2 = vadd.f32 %v158_v1, %v74_v62 }
  0xf4   :  { %v160_v3 = vpop.f32.mrf.mxu0 }
  0xf5   :  { %v161_v4 = vadd.f32 %v160_v3, %v78_v63  ;;  %v163_v6 = vmax.f32 %v159_v2, 0.0 }
  0xf7   :  { %v164_v5 = vmax.f32 %v161_v4, 0.0 }
  0xf9   :  { %262 = vmatprep.mubr.f32.mxu1 %v164_v5 }
  0xfa   :  { %263 = vmatmul.mubr.f32.vlgmr.msra.gmra.mxu1 %v163_v6 }
  0xfb   :  { %551 = vmatprep.mubr.msk.f32.mxu1 %vm654_vm2, %v653_v0  ;;  %v359_v0 = vstv %s719_s3 }
 0x1ba   :  { %v492_v12 = vpop.f32.mrf.mxu1 }
 0x1bc   :  { %v493_v14 = vpop.f32.mrf.mxu1 }
 0x1bd   :  { %v494_v15 = vadd.f32 %v493_v14, %v492_v12 }
 0x1bf   :  { %v265_v16 = vadd.f32 %v494_v15, %v197_v13 }
 0x1c1   :  { %v268_v17 = vmax.f32 %v265_v16, 0.0 }
 0x1c3   :  { %547 = vmatmul.mubr.f32.vlgmr.msra.gmra.mxu0 %v268_v17 }
 0x283   :  { %v352_v19 = vpop.f32.mrf.mxu0 }
 0x284   :  { %v353_v20 = vadd.f32 %v352_v19, %v285_v18 }
 0x285   :  { %v548_v21 = vpop.f32.mrf.mxu0 }
 0x286   :  { %v356_v22 = vmax.f32 %v353_v20, 0.0 }
 0x288   :  { %550 = vmatpush3.xpose.msk.msra.mxu1 %vm360_vm3, %v356_v22 }
 0x28b   :  { %552 = vmatmul.mubr.msk.f32.vlgmr.msra.gmra.mxu1 %vm360_vm3, %v357_v23 }
 0x34b   :  { %v433_v24 = vpop.f32.mrf.mxu1 }
 0x34c   :  { %v434_v25 = vadd.f32 %v433_v24, %v359_v0 }
 0x34d   :  { %v553_v26 = vpop.f32.mrf.mxu1 }
 0x34e   :  { %438 = vst.msk [vmem:[#allocation9] sm:$0x1] %vm437_vm4, %v434_v25 }
 0x34f   :  { %633 = shalt.err (!%p630_p5)
}
 0x350   :  { %448 = dma.vmem_to_hbm [thread:$0]  %s446_s6, 16, %s720_s4, [#allocation5]  }
 0x351   :  { %646 = dma.done.wait [#allocation5], 16  }
 0x352   :  { %647 = vsyncadd [#allocation5], 4294967280 }
 0x353   :  { %452 = vsyncpa [#allocation4], 1 }
 0x354   :  { %453 = vsyncpa [#allocation7], 1 }
 0x355   :  { %454 = vsyncpa [#allocation5], 1 }

</bundles_post_ra>
